<compile_context>
chip_gen: v7x
topology: tpu7x:2x2x1
jax: 0.10.0
libtpu: 0.0.40
codegen_flags: <defaults>
</compile_context>

<pallas_src>
import functools

import jax
import jax.numpy as jnp
from jax.experimental import pallas as pl
from jax.experimental.pallas import tpu as pltpu


_LANE = 128
_SUBLANE = 16                # token-tile alignment (works for bf16 and f32)
_MIB = 1024 * 1024


def _round_up(a, b):
    return (a + b - 1) // b * b


def _gelu_tanh(x):
    # gelu_pytorch_tanh: 0.5*x*(1 + tanh(sqrt(2/pi)*(x + 0.044715*x^3)))
    c = 0.7978845608028654
    return 0.5 * x * (1.0 + jnp.tanh(c * (x + 0.044715 * x * x * x)))


# ---------------------------------------------------------------------------
# Generation-aware tiling policy.
# ---------------------------------------------------------------------------

def _detect_generation():
    """Best-effort TPU generation detection. Never raises."""
    kind = ""
    try:
        kind = jax.devices()[0].device_kind.lower()
    except Exception:
        pass
    if "v7" in kind or "7x" in kind:
        return "v7x"
    if "v6" in kind:
        return "v6e"
    if "v5" in kind:
        return "v5e"
    return "unknown"


def _physical_vmem_bytes(gen):
    try:
        return int(pltpu.get_tpu_info().vmem_capacity_bytes)
    except Exception:
        return {"v5e": 128 * _MIB, "v6e": 128 * _MIB, "v7x": 64 * _MIB}.get(
            gen, 64 * _MIB)


# tm_target / tf_target / VMEM working-set budget / vmem_limit cap / #TensorCores
_GEN_POLICY = {
    "v5e":     dict(tm=256, tf=1024, budget=100 * _MIB, cap=110 * _MIB, cores=1),
    "v6e":     dict(tm=512, tf=512,  budget=100 * _MIB, cap=110 * _MIB, cores=1),
    "v7x":     dict(tm=384, tf=256,  budget=44 * _MIB,  cap=52 * _MIB,  cores=2),
    "unknown": dict(tm=256, tf=256,  budget=44 * _MIB,  cap=52 * _MIB,  cores=1),
}


def _vmem_bytes(tm, tf, H, x_bytes, w_bytes):
    """Conservative working-set estimate (includes elementwise temporaries)."""
    wbuf = 2 * (2 * H * tf + tf * H) * w_bytes   # w1 + w3 + w2 slices, double-buffered
    iobuf = 2 * tm * H * x_bytes * 2             # x tile + out tile, double-buffered
    acc = tm * H * 4                             # f32 accumulator scratch
    # h1, h3 (f32), gelu polynomial temporaries + gated product (~3 more f32
    # tiles), plus the cast copy that feeds the w2 matmul.
    interm = 6 * tm * tf * 4 + tm * tf * w_bytes
    return wbuf + iobuf + acc + interm


def _choose_tiles(T, H, F, x_dtype, w_dtype, gen=None):
    gen = _detect_generation() if gen is None else gen
    pol = _GEN_POLICY.get(gen, _GEN_POLICY["unknown"])
    budget = min(pol["budget"], int(0.75 * _physical_vmem_bytes(gen)))

    x_bytes = jnp.dtype(x_dtype).itemsize
    w_bytes = jnp.dtype(w_dtype).itemsize

    # FFN tile candidates: multiple-of-128 divisors of F (or F itself as fallback).
    if F % _LANE == 0:
        tf_cands = sorted(d * _LANE for d in range(1, F // _LANE + 1)
                          if F % (d * _LANE) == 0)
    else:
        tf_cands = [F]
    tf = max([c for c in tf_cands if c <= pol["tf"]] or [tf_cands[0]])

    # Token tile: as large as possible (it sets the weight-stream arithmetic
    # intensity), sublane-aligned, never larger than the padded token count.
    tm = min(pol["tm"], _round_up(max(T, 1), _SUBLANE))

    # Only chips with 2 TensorCores (v7x) benefit from forcing >=2 token tiles;
    # on single-core v5e/v6e it only halves intensity and doubles weight traffic.
    if pol["cores"] >= 2 and T > 2 * _SUBLANE and _round_up(T, tm) // tm < 2:
        tm = _round_up(-(-T // 2), _SUBLANE)

    # Shrink until the working set fits the budget.
    # Priority: preserve tm (bandwidth win on every generation), shrink tf first.
    while _vmem_bytes(tm, tf, H, x_bytes, w_bytes) > budget:
        smaller_tf = [c for c in tf_cands if c < tf]
        if smaller_tf:
            tf = smaller_tf[-1]
        elif tm > _SUBLANE:
            tm = max(_SUBLANE, _round_up(tm // 2, _SUBLANE))
        else:
            break

    return tm, tf, gen


def _vmem_limit_for(tm, tf, H, x_dtype, w_dtype, gen):
    """Scoped-VMEM limit recomputed from the ACTUAL tiles (override-safe)."""
    pol = _GEN_POLICY.get(gen, _GEN_POLICY["unknown"])
    est = _vmem_bytes(tm, tf, H,
                      jnp.dtype(x_dtype).itemsize, jnp.dtype(w_dtype).itemsize)
    return int(min(pol["cap"], max(32 * _MIB, 1.15 * est)))


# ---------------------------------------------------------------------------
# Kernel.
# ---------------------------------------------------------------------------

def _geglu_mlp_kernel(x_ref, w1_ref, w3_ref, w2_ref, o_ref, acc_ref):
    """Grid step (i, j): token tile i, FFN tile j (reduction axis).

    x_ref   : (tm, H)      current token tile
    w1_ref  : (H, tf)      gate-projection slice j
    w3_ref  : (H, tf)      up-projection slice j
    w2_ref  : (tf, H)      down-projection slice j
    o_ref   : (tm, H)      output tile (resident across j)
    acc_ref : (tm, H) f32  accumulator scratch
    """
    j = pl.program_id(1)

    @pl.when(j == 0)
    def _():
        acc_ref[...] = jnp.zeros_like(acc_ref)

    x = x_ref[...]
    h1 = jnp.dot(x, w1_ref[...], preferred_element_type=jnp.float32)   # (tm, tf)
    h3 = jnp.dot(x, w3_ref[...], preferred_element_type=jnp.float32)   # (tm, tf)
    h = _gelu_tanh(h1) * h3                                            # (tm, tf) f32

    acc_ref[...] += jnp.dot(
        h.astype(w2_ref.dtype), w2_ref[...], preferred_element_type=jnp.float32
    )

    @pl.when(j == pl.num_programs(1) - 1)
    def _():
        o_ref[...] = acc_ref[...].astype(o_ref.dtype)   # matches .to(hidden_states.dtype)


@functools.partial(jax.jit, static_argnames=("tm", "tf", "vmem_limit"))
def _geglu_mlp_impl(x, w1, w3, w2, *, tm, tf, vmem_limit):
    T, H = x.shape
    F = w1.shape[1]
    assert F % tf == 0, (F, tf)

    # Pad ragged ("Dyn" MoE) token counts; padded zero rows yield exact zeros.
    T_pad = _round_up(max(T, 1), tm)
    if T_pad != T:
        x = jnp.pad(x, ((0, T_pad - T), (0, 0)))

    grid = (T_pad // tm, F // tf)
    out = pl.pallas_call(
        _geglu_mlp_kernel,
        out_shape=jax.ShapeDtypeStruct((T_pad, H), x.dtype),
        grid_spec=pltpu.PrefetchScalarGridSpec(
            num_scalar_prefetch=0,
            grid=grid,
            in_specs=[
                pl.BlockSpec((tm, H), lambda i, j: (i, 0)),   # x tile
                pl.BlockSpec((H, tf), lambda i, j: (0, j)),   # w1 slice
                pl.BlockSpec((H, tf), lambda i, j: (0, j)),   # w3 slice
                pl.BlockSpec((tf, H), lambda i, j: (j, 0)),   # w2 slice
            ],
            out_specs=pl.BlockSpec((tm, H), lambda i, j: (i, 0)),
            scratch_shapes=[pltpu.VMEM((tm, H), jnp.float32)],
        ),
        compiler_params=pltpu.CompilerParams(
            dimension_semantics=("parallel", "arbitrary"),
            vmem_limit_bytes=vmem_limit,
        ),
    )(x, w1, w3, w2)
    return out[:T]


def geglu_mlp(x, w1, w3, w2, *, tm=None, tf=None):
    """x: [T, H]; w1, w3: [H, F]; w2: [F, H]. Returns [T, H] in x.dtype."""
    T, H = x.shape
    F = w1.shape[1]
    tm_auto, tf_auto, gen = _choose_tiles(T, H, F, x.dtype, w1.dtype)
    tm = tm_auto if tm is None else tm
    tf = tf_auto if tf is None else tf
    # Recompute the limit from the actual tiles so caller overrides can't
    # exceed the compiled vmem_limit_bytes.
    vmem_limit = _vmem_limit_for(tm, tf, H, x.dtype, w1.dtype, gen)
    return _geglu_mlp_impl(x, w1, w3, w2, tm=tm, tf=tf, vmem_limit=vmem_limit)


def geglu_mlp_reference(x, w1, w3, w2):
    xf = x.astype(jnp.float32)
    h = _gelu_tanh(jnp.dot(xf, w1.astype(jnp.float32))) * jnp.dot(
        xf, w3.astype(jnp.float32)
    )
    return jnp.dot(h, w2.astype(jnp.float32)).astype(x.dtype)


if __name__ == "__main__":
    key = jax.random.PRNGKey(0)
    kx, k1, k2, k3, kx2 = jax.random.split(key, 5)

    # Small config: hidden_size=128, intermediate_size=256, ragged token count 10
    # (exercises the zero-padding path used for dynamic per-expert token counts).
    T, H, F = 10, 128, 256

    x = jax.random.normal(kx, (T, H), dtype=jnp.float32)
    # nn.Linear(hidden, ffn).weight is [ffn, hidden]; we store its transpose.
    w1 = 0.02 * jax.random.normal(k1, (H, F), dtype=jnp.float32)
    w3 = 0.02 * jax.random.normal(k3, (H, F), dtype=jnp.float32)
    w2 = 0.02 * jax.random.normal(k2, (F, H), dtype=jnp.float32)

    # f32 path, auto-chosen tiles (tight check).
    out = jax.block_until_ready(geglu_mlp(x, w1, w3, w2))
    ref = geglu_mlp_reference(x, w1, w3, w2)
    assert out.shape == (T, H) and out.dtype == x.dtype
    assert jnp.allclose(out, ref, atol=1e-4, rtol=1e-4)

    # Multi-tile grid: several token tiles + FFN reduction over >1 block
    # (exercises the resident-accumulator path and override-safe vmem limit).
    T2 = 40
    x2 = jax.random.normal(kx2, (T2, H), dtype=jnp.float32)
    out2 = jax.block_until_ready(geglu_mlp(x2, w1, w3, w2, tm=16, tf=128))
    ref2 = geglu_mlp_reference(x2, w1, w3, w2)
    assert out2.shape == (T2, H)
    assert jnp.allclose(out2, ref2, atol=1e-4, rtol=1e-4)

    # bf16 path (intended production dtype; loose check).
    xb, w1b, w3b, w2b = (a.astype(jnp.bfloat16) for a in (x, w1, w3, w2))
    out_b = jax.block_until_ready(geglu_mlp(xb, w1b, w3b, w2b))
    ref_b = geglu_mlp_reference(xb, w1b, w3b, w2b)
    assert out_b.shape == (T, H) and out_b.dtype == jnp.bfloat16
    assert jnp.allclose(out_b.astype(jnp.float32), ref_b.astype(jnp.float32),
                        atol=2e-2, rtol=2e-2)

    print("KERNEL_OK")
</pallas_src>

<mosaic_0001>
module attributes {stable_mosaic.version = 11 : i64} {
  func.func @_geglu_mlp_kernel(%arg0: i32, %arg1: i32, %arg2: memref<16x128xf32, #tpu.memory_space<vmem>>, %arg3: memref<128x256xf32, #tpu.memory_space<vmem>>, %arg4: memref<128x256xf32, #tpu.memory_space<vmem>>, %arg5: memref<256x128xf32, #tpu.memory_space<vmem>>, %arg6: memref<16x128xf32, #tpu.memory_space<vmem>>, %arg7: memref<16x128xf32, #tpu.memory_space<vmem>>) attributes {dimension_semantics = [#tpu.dimension_semantics<parallel>, #tpu.dimension_semantics<arbitrary>], iteration_bounds = array<i64: 1, 1>, scalar_prefetch = 0 : i64, scratch_operands = 1 : i64, tpu.core_type = #tpu.core_type<tc>, window_params = [{transform_indices = @transform_0, window_bounds = array<i64: 16, 128>}, {transform_indices = @transform_1, window_bounds = array<i64: 128, 256>}, {transform_indices = @transform_2, window_bounds = array<i64: 128, 256>}, {transform_indices = @transform_3, window_bounds = array<i64: 256, 128>}, {transform_indices = @transform_4, window_bounds = array<i64: 16, 128>}]} {
    %c0_i32 = arith.constant 0 : i32
    %0 = arith.cmpi eq, %arg1, %c0_i32 : i32
    %1 = arith.extui %0 : i1 to i32
    %c0_i32_0 = arith.constant 0 : i32
    %2 = arith.cmpi ne, %1, %c0_i32_0 : i32
    scf.if %2 {
      %cst_20 = arith.constant 0.000000e+00 : f32
      %30 = vector.broadcast %cst_20 : f32 to vector<16x128xf32>
      %c0_21 = arith.constant 0 : index
      %c0_22 = arith.constant 0 : index
      %31 = vector.load %arg7[%c0_21, %c0_22] : memref<16x128xf32, #tpu.memory_space<vmem>>, vector<16x128xf32>
      tpu.vector_store %arg7[%c0_21, %c0_22], %30 {strides = array<i32>} : memref<16x128xf32, #tpu.memory_space<vmem>>, vector<16x128xf32>,
    } else {
    }
    %c0 = arith.constant 0 : index
    %c0_1 = arith.constant 0 : index
    %3 = vector.load %arg2[%c0, %c0_1] : memref<16x128xf32, #tpu.memory_space<vmem>>, vector<16x128xf32>
    %c0_2 = arith.constant 0 : index
    %c0_3 = arith.constant 0 : index
    %4 = vector.load %arg3[%c0_2, %c0_3] : memref<128x256xf32, #tpu.memory_space<vmem>>, vector<128x256xf32>
    %cst = arith.constant dense<0.000000e+00> : vector<16x256xf32>
    %5 = tpu.matmul %3, %4, %cst {dimension_numbers = #tpu.dot_dimension_numbers<[1], [0], [0], [1], [0, 0, 1, 1], [], []>} : vector<16x128xf32>, vector<128x256xf32>, vector<16x256xf32> -> vector<16x256xf32>
    %c0_4 = arith.constant 0 : index
    %c0_5 = arith.constant 0 : index
    %6 = vector.load %arg4[%c0_4, %c0_5] : memref<128x256xf32, #tpu.memory_space<vmem>>, vector<128x256xf32>
    %cst_6 = arith.constant dense<0.000000e+00> : vector<16x256xf32>
    %7 = tpu.matmul %3, %6, %cst_6 {dimension_numbers = #tpu.dot_dimension_numbers<[1], [0], [0], [1], [0, 0, 1, 1], [], []>} : vector<16x128xf32>, vector<128x256xf32>, vector<16x256xf32> -> vector<16x256xf32>
    %cst_7 = arith.constant 5.000000e-01 : f32
    %8 = vector.broadcast %cst_7 : f32 to vector<16x256xf32>
    %9 = arith.mulf %8, %5 : vector<16x256xf32>
    %cst_8 = arith.constant 4.471500e-02 : f32
    %10 = vector.broadcast %cst_8 : f32 to vector<16x256xf32>
    %11 = arith.mulf %10, %5 : vector<16x256xf32>
    %12 = arith.mulf %11, %5 : vector<16x256xf32>
    %13 = arith.mulf %12, %5 : vector<16x256xf32>
    %14 = arith.addf %5, %13 : vector<16x256xf32>
    %cst_9 = arith.constant 0.797884583 : f32
    %15 = vector.broadcast %cst_9 : f32 to vector<16x256xf32>
    %16 = arith.mulf %15, %14 : vector<16x256xf32>
    %17 = math.tanh %16 : vector<16x256xf32>
    %cst_10 = arith.constant 1.000000e+00 : f32
    %18 = vector.broadcast %cst_10 : f32 to vector<16x256xf32>
    %19 = arith.addf %18, %17 : vector<16x256xf32>
    %20 = arith.mulf %9, %19 : vector<16x256xf32>
    %21 = arith.mulf %20, %7 : vector<16x256xf32>
    %c0_11 = arith.constant 0 : index
    %c0_12 = arith.constant 0 : index
    %22 = vector.load %arg7[%c0_11, %c0_12] : memref<16x128xf32, #tpu.memory_space<vmem>>, vector<16x128xf32>
    %c0_13 = arith.constant 0 : index
    %c0_14 = arith.constant 0 : index
    %23 = vector.load %arg5[%c0_13, %c0_14] : memref<256x128xf32, #tpu.memory_space<vmem>>, vector<256x128xf32>
    %cst_15 = arith.constant dense<0.000000e+00> : vector<16x128xf32>
    %24 = tpu.matmul %21, %23, %cst_15 {dimension_numbers = #tpu.dot_dimension_numbers<[1], [0], [0], [1], [0, 0, 1, 1], [], []>} : vector<16x256xf32>, vector<256x128xf32>, vector<16x128xf32> -> vector<16x128xf32>
    %25 = arith.addf %22, %24 : vector<16x128xf32>
    %c0_16 = arith.constant 0 : index
    %c0_17 = arith.constant 0 : index
    %26 = vector.load %arg7[%c0_16, %c0_17] : memref<16x128xf32, #tpu.memory_space<vmem>>, vector<16x128xf32>
    tpu.vector_store %arg7[%c0_16, %c0_17], %25 {strides = array<i32>} : memref<16x128xf32, #tpu.memory_space<vmem>>, vector<16x128xf32>,
    %c0_i32_18 = arith.constant 0 : i32
    %27 = arith.cmpi eq, %arg1, %c0_i32_18 : i32
    %28 = arith.extui %27 : i1 to i32
    %c0_i32_19 = arith.constant 0 : i32
    %29 = arith.cmpi ne, %28, %c0_i32_19 : i32
    scf.if %29 {
      %c0_20 = arith.constant 0 : index
      %c0_21 = arith.constant 0 : index
      %30 = vector.load %arg7[%c0_20, %c0_21] : memref<16x128xf32, #tpu.memory_space<vmem>>, vector<16x128xf32>
      %c0_22 = arith.constant 0 : index
      %c0_23 = arith.constant 0 : index
      %31 = vector.load %arg6[%c0_22, %c0_23] : memref<16x128xf32, #tpu.memory_space<vmem>>, vector<16x128xf32>
      tpu.vector_store %arg6[%c0_22, %c0_23], %30 {strides = array<i32>} : memref<16x128xf32, #tpu.memory_space<vmem>>, vector<16x128xf32>,
    } else {
    }
    return
  }
  func.func @transform_0(%arg0: i32, %arg1: i32) -> (i32, i32) {
    %c0_i32 = arith.constant 0 : i32
    %c0_i32_0 = arith.constant 0 : i32
    return %arg0, %c0_i32 : i32, i32
  }
  func.func @transform_1(%arg0: i32, %arg1: i32) -> (i32, i32) {
    %c0_i32 = arith.constant 0 : i32
    %c0_i32_0 = arith.constant 0 : i32
    return %c0_i32, %arg1 : i32, i32
  }
  func.func @transform_2(%arg0: i32, %arg1: i32) -> (i32, i32) {
    %c0_i32 = arith.constant 0 : i32
    %c0_i32_0 = arith.constant 0 : i32
    return %c0_i32, %arg1 : i32, i32
  }
  func.func @transform_3(%arg0: i32, %arg1: i32) -> (i32, i32) {
    %c0_i32 = arith.constant 0 : i32
    %c0_i32_0 = arith.constant 0 : i32
    return %arg1, %c0_i32 : i32, i32
  }
  func.func @transform_4(%arg0: i32, %arg1: i32) -> (i32, i32) {
    %c0_i32 = arith.constant 0 : i32
    %c0_i32_0 = arith.constant 0 : i32
    return %arg0, %c0_i32 : i32, i32
  }
}

</mosaic_0001>

<bundles_post_ra>
// kernel: _geglu_mlp_impl.1
= control target key start
LH: loop header
LB: loop body
LE: loop exit
PB: predicated region body
PF: predicated region fallthrough
CT: control target
= control target key end

     0   :  { %9 = vsyncpa [#allocation4], 0  ;;  %s829_s0 = inlined_call_operand.vmem [shape: f32[16,128], index: 0, kind: input, shape index: {}]   ;;  %s830_s1 = inlined_call_operand.hbm [shape: f32[128,256], index: 1, kind: input, shape index: {}]   ;;  %s831_s2 = inlined_call_operand.hbm [shape: f32[128,256], index: 2, kind: input, shape index: {}]   ;;  %s832_s3 = inlined_call_operand.hbm [shape: f32[256,128], index: 3, kind: input, shape index: {}]   ;;  %s833_s4 = inlined_call_operand.hbm [shape: f32[16,128], index: 4, kind: output, shape index: {}]  }
   0x1   :  { %10 = vsyncpa [#allocation7], 0 }
   0x2   :  { %11 = vsyncpa [#allocation5], 0  ;;  %s724_s15 = smov [#allocation6]   ;;  %s725_s17 = smov [#allocation3]  }
   0x3   :  { %s31_s16 = sshll.u32 %s724_s15, 4  ;;  %s19_s18 = sshll.u32 %s725_s17, 4  ;;  %s32_s16 = int_to_ptr.vmem [resolvable:$true] %s31_s16  ;;  %s758_s18 = int_to_ptr.vmem [resolvable:$true] %s19_s18 }
   0x4   :  { %s630_s21 = scalar_lea.hbm %s831_s2, 4096 }
   0x5   :  { %p631_p0 = scmp.ne.s32.totalorder %s831_s2, %s630_s21  ;;  %p634_p1 = scmp.lt.u32.totalorder %s630_s21, %s831_s2 }
   0x7   :  { %p636_p2 = pnand %p634_p1, %p631_p0 }
   0x9   :  { %639 = shalt.err (!%p636_p2)
}
   0xa   :  { %s640_s26 = scalar_lea.vmem %s32_s16, 4096  ;;  %p645_p4 = scmp.lt.s32.totalorder %s32_s16, %s32_s16 }
   0xb   :  { %p641_p3 = scmp.ne.s32.totalorder %s32_s16, %s640_s26  ;;  %p646_p5 = scmp.lt.s32.totalorder %s640_s26, %s640_s26 }
   0xd   :  { %p647_p6 = por %p646_p5, %p645_p4 }
   0xf   :  { %p648_p7 = pnand %p647_p6, %p641_p3 }
  0x11   :  { %651 = shalt.err (!%p648_p7)
}
  0x12   :  { %s726_s27 = smov 256   ;;  %s727_s28 = smov 16  }
  0x13   :  { %37 = dma.hbm_to_vmem [thread:$0]  %s831_s2, 4096, %s32_s16, [#allocation7], %s726_s27, %s726_s27, %s727_s28  }
  0x14   :  { %s652_s7 = scalar_lea.hbm %s830_s1, 4096 }
  0x15   :  { %p653_p8 = scmp.ne.s32.totalorder %s830_s1, %s652_s7  ;;  %p656_p9 = scmp.lt.u32.totalorder %s652_s7, %s830_s1 }
  0x17   :  { %p658_p10 = pnand %p656_p9, %p653_p8 }
  0x19   :  { %661 = shalt.err (!%p658_p10)
}
  0x1a   :  { %s662_s12 = scalar_lea.vmem %s758_s18, 4096  ;;  %p667_p12 = scmp.lt.s32.totalorder %s758_s18, %s758_s18 }
  0x1b   :  { %p663_p11 = scmp.ne.s32.totalorder %s758_s18, %s662_s12  ;;  %p668_p13 = scmp.lt.s32.totalorder %s662_s12, %s662_s12 }
  0x1d   :  { %p669_p0 = por %p668_p13, %p667_p12 }
  0x1f   :  { %p670_p1 = pnand %p669_p0, %p663_p11 }
  0x21   :  { %673 = shalt.err (!%p670_p1)
}
  0x22   :  { %25 = dma.hbm_to_vmem [thread:$0]  %s830_s1, 4096, %s758_s18, [#allocation4], %s726_s27, %s726_s27, %s727_s28  }
  0x23   :  { %s728_s14 = smov [#allocation8]   ;;  %s674_s19 = scalar_lea.hbm %s832_s3, 4096 }
  0x24   :  { %s43_s15 = sshll.u32 %s728_s14, 4  ;;  %p675_p2 = scmp.ne.s32.totalorder %s832_s3, %s674_s19  ;;  %s44_s15 = int_to_ptr.vmem [resolvable:$true] %s43_s15 }
  0x25   :  { %p678_p3 = scmp.lt.u32.totalorder %s674_s19, %s832_s3 }
  0x27   :  { %p680_p4 = pnand %p678_p3, %p675_p2 }
  0x29   :  { %683 = shalt.err (!%p680_p4)
}
  0x2a   :  { %s684_s24 = scalar_lea.vmem %s44_s15, 4096  ;;  %p689_p6 = scmp.lt.s32.totalorder %s44_s15, %s44_s15 }
  0x2b   :  { %p685_p5 = scmp.ne.s32.totalorder %s44_s15, %s684_s24  ;;  %p690_p7 = scmp.lt.s32.totalorder %s684_s24, %s684_s24 }
  0x2d   :  { %p691_p8 = por %p690_p7, %p689_p6 }
  0x2f   :  { %p692_p9 = pnand %p691_p8, %p685_p5 }
  0x31   :  { %695 = shalt.err (!%p692_p9)
}
  0x32   :  { %s729_s1 = smov 128   ;;  %s730_s18 = smov 8  }
  0x33   :  { %49 = dma.hbm_to_vmem [thread:$0]  %s832_s3, 4096, %s44_s15, [#allocation7], %s729_s1, %s729_s1, %s730_s18  }
  0x34   :  { %718 = dma.done.wait [#allocation4], 4096  }
  0x35   :  { %719 = vsyncadd [#allocation4], 4294963200 }
  0x36   :  { %720 = dma.done.wait [#allocation7], 8192  }
  0x37   :  { %721 = vsyncadd [#allocation7], 4294959104  ;;  %v731_v0 = vmov 0.0   ;;  %v68_v1 = vld [vmem:[#allocation3 + $0x8] sm:$0xff]  ;;  %v70_v2 = vld [vmem:[#allocation3 + $0x18] sm:$0xff] }
  0x38   :  { %163 = vmatprep.mubr.f32.mxu0 %v731_v0  ;;  %272 = vmatprep.mubr.f32.mxu1 %v731_v0  ;;  %v67_v3 = vld [vmem:[#allocation3] sm:$0xff]  ;;  %v501_v4 = vpack.c.bf16 %v70_v2, %v68_v1  ;;  %v69_v5 = vld [vmem:[#allocation3 + $0x10] sm:$0xff]  ;;  %v72_v6 = vld [vmem:[#allocation3 + $0x28] sm:$0xff] }
  0x39   :  { %v74_v7 = vld [vmem:[#allocation3 + $0x38] sm:$0xff]  ;;  %v503_v8 = vpack.c.bf16 %v69_v5, %v67_v3  ;;  %v71_v10 = vld [vmem:[#allocation3 + $0x20] sm:$0xff]  ;;  %v73_v11 = vld [vmem:[#allocation3 + $0x30] sm:$0xff] }
  0x3a   :  { %v505_v9 = vpack.c.bf16 %v74_v7, %v72_v6  ;;  %v76_v12 = vld [vmem:[#allocation3 + $0x48] sm:$0xff]  ;;  %502 = vmatprep.subr.bf16.mxu0 %v501_v4  ;;  %v78_v13 = vld [vmem:[#allocation3 + $0x58] sm:$0xff]  ;;  %v507_v14 = vpack.c.bf16 %v73_v11, %v71_v10  ;;  %v75_v16 = vld [vmem:[#allocation3 + $0x40] sm:$0xff] }
  0x3b   :  { %504 = vmatpush1.bf16.msra.mxu0 %v503_v8  ;;  %v509_v15 = vpack.c.bf16 %v78_v13, %v76_v12  ;;  %v77_v17 = vld [vmem:[#allocation3 + $0x50] sm:$0xff]  ;;  %v80_v18 = vld [vmem:[#allocation3 + $0x68] sm:$0xff]  ;;  %v82_v19 = vld [vmem:[#allocation3 + $0x78] sm:$0xff] }
  0x3c   :  { %506 = vmatprep.subr.bf16.mxu0 %v505_v9  ;;  %v511_v20 = vpack.c.bf16 %v77_v17, %v75_v16  ;;  %v79_v21 = vld [vmem:[#allocation3 + $0x60] sm:$0xff]  ;;  %v177_v22 = vld [vmem:[#allocation6 + $0x8] sm:$0xff]  ;;  %v513_v23 = vpack.c.bf16 %v82_v19, %v80_v18  ;;  %v81_v24 = vld [vmem:[#allocation3 + $0x70] sm:$0xff] }
  0x3d   :  { %v84_v25 = vld [vmem:[#allocation3 + $0x88] sm:$0xff]  ;;  %v179_v26 = vld [vmem:[#allocation6 + $0x18] sm:$0xff]  ;;  %v176_v29 = vld [vmem:[#allocation6] sm:$0xff]  ;;  %v515_v35 = vpack.c.bf16 %v81_v24, %v79_v21 }
  0x3e   :  { %v86_v27 = vld [vmem:[#allocation3 + $0x98] sm:$0xff]  ;;  %v533_v28 = vpack.c.bf16 %v179_v26, %v177_v22  ;;  %v178_v30 = vld [vmem:[#allocation6 + $0x10] sm:$0xff]  ;;  %v83_v31 = vld [vmem:[#allocation3 + $0x80] sm:$0xff] }
  0x3f   :  { %508 = vmatpush1.bf16.msra.mxu0 %v507_v14  ;;  %v535_v32 = vpack.c.bf16 %v178_v30, %v176_v29  ;;  %v181_v33 = vld [vmem:[#allocation6 + $0x28] sm:$0xff]  ;;  %v183_v34 = vld [vmem:[#allocation6 + $0x38] sm:$0xff]  ;;  %v85_v36 = vld [vmem:[#allocation3 + $0x90] sm:$0xff]  ;;  %v517_v40 = vpack.c.bf16 %v86_v27, %v84_v25 }
  0x40   :  { %510 = vmatprep.subr.bf16.mxu0 %v509_v15  ;;  %v88_v37 = vld [vmem:[#allocation3 + $0xa8] sm:$0xff]  ;;  %534 = vmatprep.subr.bf16.mxu1 %v533_v28  ;;  %v537_v38 = vpack.c.bf16 %v183_v34, %v181_v33  ;;  %v180_v39 = vld [vmem:[#allocation6 + $0x20] sm:$0xff]  ;;  %v90_v41 = vld [vmem:[#allocation3 + $0xb8] sm:$0xff]  ;;  %v519_v51 = vpack.c.bf16 %v85_v36, %v83_v31 }
  0x41   :  { %536 = vmatpush1.bf16.msra.mxu1 %v535_v32  ;;  %v182_v42 = vld [vmem:[#allocation6 + $0x30] sm:$0xff]  ;;  %v185_v43 = vld [vmem:[#allocation6 + $0x48] sm:$0xff]  ;;  %v187_v45 = vld [vmem:[#allocation6 + $0x58] sm:$0xff]  ;;  %v521_v52 = vpack.c.bf16 %v90_v41, %v88_v37 }
  0x42   :  { %538 = vmatprep.subr.bf16.mxu1 %v537_v38  ;;  %v539_v44 = vpack.c.bf16 %v182_v42, %v180_v39  ;;  %v184_v46 = vld [vmem:[#allocation6 + $0x40] sm:$0xff]  ;;  %v186_v47 = vld [vmem:[#allocation6 + $0x50] sm:$0xff]  ;;  %v541_v48 = vpack.c.bf16 %v187_v45, %v185_v43  ;;  %v189_v49 = vld [vmem:[#allocation6 + $0x68] sm:$0xff] }
  0x43   :  { %512 = vmatpush1.bf16.msra.mxu0 %v511_v20  ;;  %v191_v50 = vld [vmem:[#allocation6 + $0x78] sm:$0xff]  ;;  %v87_v53 = vld [vmem:[#allocation3 + $0xa0] sm:$0xff]  ;;  %v89_v54 = vld [vmem:[#allocation3 + $0xb0] sm:$0xff]  ;;  %v543_v56 = vpack.c.bf16 %v186_v47, %v184_v46 }
  0x44   :  { %514 = vmatprep.subr.bf16.mxu0 %v513_v23  ;;  %v92_v55 = vld [vmem:[#allocation3 + $0xc8] sm:$0xff]  ;;  %v94_v57 = vld [vmem:[#allocation3 + $0xd8] sm:$0xff]  ;;  %v545_v58 = vpack.c.bf16 %v191_v50, %v189_v49  ;;  %v188_v59 = vld [vmem:[#allocation6 + $0x60] sm:$0xff]  ;;  %v523_v63 = vpack.c.bf16 %v89_v54, %v87_v53 }
  0x45   :  { %540 = vmatpush1.bf16.msra.mxu1 %v539_v44  ;;  %v190_v60 = vld [vmem:[#allocation6 + $0x70] sm:$0xff]  ;;  %v193_v61 = vld [vmem:[#allocation6 + $0x88] sm:$0xff]  ;;  %v195_v62 = vld [vmem:[#allocation6 + $0x98] sm:$0xff]  ;;  %v525_v1 = vpack.c.bf16 %v94_v57, %v92_v55 }
  0x46   :  { %542 = vmatprep.subr.bf16.mxu1 %v541_v48  ;;  %v91_v2 = vld [vmem:[#allocation3 + $0xc0] sm:$0xff]  ;;  %v93_v3 = vld [vmem:[#allocation3 + $0xd0] sm:$0xff]  ;;  %v96_v4 = vld [vmem:[#allocation3 + $0xe8] sm:$0xff]  ;;  %v547_v5 = vpack.c.bf16 %v190_v60, %v188_v59  ;;  %v549_v7 = vpack.c.bf16 %v195_v62, %v193_v61 }
  0x47   :  { %516 = vmatpush1.bf16.msra.mxu0 %v515_v35  ;;  %v98_v6 = vld [vmem:[#allocation3 + $0xf8] sm:$0xff]  ;;  %v192_v8 = vld [vmem:[#allocation6 + $0x80] sm:$0xff]  ;;  %v194_v9 = vld [vmem:[#allocation6 + $0x90] sm:$0xff]  ;;  %v527_v12 = vpack.c.bf16 %v93_v3, %v91_v2 }
  0x48   :  { %518 = vmatprep.subr.bf16.mxu0 %v517_v40  ;;  %v197_v10 = vld [vmem:[#allocation6 + $0xa8] sm:$0xff]  ;;  %v199_v11 = vld [vmem:[#allocation6 + $0xb8] sm:$0xff]  ;;  %v529_v13 = vpack.c.bf16 %v98_v6, %v96_v4  ;;  %v95_v14 = vld [vmem:[#allocation3 + $0xe0] sm:$0xff]  ;;  %v551_v16 = vpack.c.bf16 %v194_v9, %v192_v8 }
  0x49   :  { %544 = vmatpush1.bf16.msra.mxu1 %v543_v56  ;;  %v97_v15 = vld [vmem:[#allocation3 + $0xf0] sm:$0xff]  ;;  %v196_v17 = vld [vmem:[#allocation6 + $0xa0] sm:$0xff]  ;;  %v553_v18 = vpack.c.bf16 %v199_v11, %v197_v10  ;;  %v344_v21 = vld [vmem:[#allocation8 + $0x88] sm:$0xff] }
  0x4a   :  { %546 = vmatprep.subr.bf16.mxu1 %v545_v58  ;;  %v198_v19 = vld [vmem:[#allocation6 + $0xb0] sm:$0xff]  ;;  %v343_v20 = vld [vmem:[#allocation8 + $0x80] sm:$0xff]  ;;  %v201_v22 = vld [vmem:[#allocation6 + $0xc8] sm:$0xff]  ;;  %v531_v24 = vpack.c.bf16 %v97_v15, %v95_v14 }
  0x4b   :  { %520 = vmatpush1.bf16.msra.mxu0 %v519_v51  ;;  %v203_v23 = vld [vmem:[#allocation6 + $0xd8] sm:$0xff]  ;;  %v555_v25 = vpack.c.bf16 %v198_v19, %v196_v17  ;;  %v565_v26 = vpack.c.bf16 %v344_v21, %v343_v20  ;;  %v327_v27 = vld [vmem:[#allocation8] sm:$0xff]  ;;  %v328_v28 = vld [vmem:[#allocation8 + $0x8] sm:$0xff] }
  0x4c   :  { %522 = vmatprep.subr.bf16.mxu0 %v521_v52  ;;  %v557_v29 = vpack.c.bf16 %v203_v23, %v201_v22  ;;  %v200_v30 = vld [vmem:[#allocation6 + $0xc0] sm:$0xff]  ;;  %v202_v31 = vld [vmem:[#allocation6 + $0xd0] sm:$0xff]  ;;  %v205_v32 = vld [vmem:[#allocation6 + $0xe8] sm:$0xff]  ;;  %v567_v35 = vpack.c.bf16 %v328_v28, %v327_v27 }
  0x4d   :  { %548 = vmatpush1.bf16.msra.mxu1 %v547_v5  ;;  %v207_v33 = vld [vmem:[#allocation6 + $0xf8] sm:$0xff]  ;;  %v65_v34 = vld [vmem:[%s829_s0] sm:$0xff]  ;;  %v559_v36 = vpack.c.bf16 %v202_v31, %v200_v30  ;;  %v204_v38 = vld [vmem:[#allocation6 + $0xe0] sm:$0xff] }
  0x4e   :  { %550 = vmatprep.subr.bf16.mxu1 %v549_v7  ;;  %v561_v37 = vpack.c.bf16 %v207_v33, %v205_v32  ;;  %v206_v39 = vld [vmem:[#allocation6 + $0xf0] sm:$0xff]  ;;  %v66_v40 = vld [vmem:[%s829_s0 + $0x8] sm:$0xff]  ;;  %v347_v48 = vld [vmem:[#allocation8 + $0xa0] sm:$0xff]  ;;  %s732_s0 = smov [#allocation9]  }
  0x4f   :  { %524 = vmatpush1.bf16.msra.mxu0 %v523_v63  ;;  %v563_v41 = vpack.c.bf16 %v206_v39, %v204_v38  ;;  %v345_v42 = vld [vmem:[#allocation8 + $0x90] sm:$0xff]  ;;  %v346_v43 = vld [vmem:[#allocation8 + $0x98] sm:$0xff]  ;;  %v348_v49 = vld [vmem:[#allocation8 + $0xa8] sm:$0xff]  ;;  %s450_s30 = sshll.u32 %s732_s0, 4  ;;  %s451_s30 = int_to_ptr.vmem [resolvable:$true] %s450_s30 }
  0x50   :  { %526 = vmatprep.subr.bf16.mxu0 %v525_v1  ;;  %v569_v44 = vpack.c.bf16 %v346_v43, %v345_v42  ;;  %v329_v45 = vld [vmem:[#allocation8 + $0x10] sm:$0xff]  ;;  %v330_v46 = vld [vmem:[#allocation8 + $0x18] sm:$0xff]  ;;  %v573_v50 = vpack.c.bf16 %v348_v49, %v347_v48  ;;  %v331_v51 = vld [vmem:[#allocation8 + $0x20] sm:$0xff]  ;;  %s696_s5 = scalar_lea.vmem %s451_s30, 256  ;;  %p701_p11 = scmp.lt.s32.totalorder %s451_s30, %s451_s30 }
  0x51   :  { %552 = vmatpush1.bf16.msra.mxu1 %v551_v16  ;;  %v571_v47 = vpack.c.bf16 %v330_v46, %v329_v45  ;;  %v332_v52 = vld [vmem:[#allocation8 + $0x28] sm:$0xff]  ;;  %v350_v54 = vld [vmem:[#allocation8 + $0xb8] sm:$0xff]  ;;  %v333_v56 = vld [vmem:[#allocation8 + $0x30] sm:$0xff]  ;;  %p697_p10 = scmp.ne.s32.totalorder %s451_s30, %s696_s5  ;;  %p702_p12 = scmp.lt.s32.totalorder %s696_s5, %s696_s5 }
  0x52   :  { %554 = vmatprep.subr.bf16.mxu1 %v553_v18  ;;  %v575_v53 = vpack.c.bf16 %v332_v52, %v331_v51  ;;  %v334_v57 = vld [vmem:[#allocation8 + $0x38] sm:$0xff]  ;;  %v351_v59 = vld [vmem:[#allocation8 + $0xc0] sm:$0xff]  ;;  %v352_v60 = vld [vmem:[#allocation8 + $0xc8] sm:$0xff] }
  0x53   :  { %528 = vmatpush1.bf16.msra.mxu0 %v527_v12  ;;  %v579_v58 = vpack.c.bf16 %v334_v57, %v333_v56  ;;  %v335_v61 = vld [vmem:[#allocation8 + $0x40] sm:$0xff]  ;;  %v581_v62 = vpack.c.bf16 %v352_v60, %v351_v59  ;;  %v336_v63 = vld [vmem:[#allocation8 + $0x48] sm:$0xff]  ;;  %v353_v1 = vld [vmem:[#allocation8 + $0xd0] sm:$0xff]  ;;  %p703_p13 = por %p702_p12, %p701_p11 }
  0x54   :  { %530 = vmatprep.subr.bf16.mxu0 %v529_v13  ;;  %v354_v2 = vld [vmem:[#allocation8 + $0xd8] sm:$0xff]  ;;  %v583_v3 = vpack.c.bf16 %v336_v63, %v335_v61  ;;  %v337_v5 = vld [vmem:[#allocation8 + $0x50] sm:$0xff]  ;;  %v355_v7 = vld [vmem:[#allocation8 + $0xe0] sm:$0xff] }
  0x55   :  { %556 = vmatpush1.bf16.msra.mxu1 %v555_v25  ;;  %v585_v4 = vpack.c.bf16 %v354_v2, %v353_v1  ;;  %v338_v6 = vld [vmem:[#allocation8 + $0x58] sm:$0xff]  ;;  %v356_v8 = vld [vmem:[#allocation8 + $0xe8] sm:$0xff]  ;;  %v339_v11 = vld [vmem:[#allocation8 + $0x60] sm:$0xff]  ;;  %p704_p0 = pnand %p703_p13, %p697_p10 }
  0x56   :  { %558 = vmatprep.subr.bf16.mxu1 %v557_v29  ;;  %v587_v9 = vpack.c.bf16 %v338_v6, %v337_v5  ;;  %v589_v10 = vpack.c.bf16 %v356_v8, %v355_v7  ;;  %v340_v12 = vld [vmem:[#allocation8 + $0x68] sm:$0xff]  ;;  %v357_v14 = vld [vmem:[#allocation8 + $0xf0] sm:$0xff]  ;;  %v358_v15 = vld [vmem:[#allocation8 + $0xf8] sm:$0xff] }
  0x57   :  { %532 = vmatpush1.bf16.msra.mxu0 %v531_v24  ;;  %v591_v13 = vpack.c.bf16 %v340_v12, %v339_v11  ;;  %v593_v16 = vpack.c.bf16 %v358_v15, %v357_v14  ;;  %v341_v17 = vld [vmem:[#allocation8 + $0x70] sm:$0xff]  ;;  %v342_v18 = vld [vmem:[#allocation8 + $0x78] sm:$0xff] }
  0x58   :  { %566 = vmatprep.subr.bf16.mxu0 %v565_v26  ;;  %v595_v19 = vpack.c.bf16 %v342_v18, %v341_v17 }
  0x59   :  { %560 = vmatpush1.bf16.msra.mxu1 %v559_v36 }
  0x5a   :  { %164 = vmatmul.mubr.f32.vlgmr.msra.gmra.mrb[0].mxu0 %v65_v34  ;;  %562 = vmatprep.subr.bf16.mxu1 %v561_v37 }
  0x5b   :  { %169 = vmatprep.mubr.f32.mxu0 %v731_v0  ;;  %568 = vmatpush3.bf16.msra.mxu0 %v567_v35 }
  0x5c   :  { %570 = vmatprep.subr.bf16.mxu0 %v569_v44 }
  0x5d   :  { %564 = vmatpush1.bf16.msra.mxu1 %v563_v41 }
  0x5e   :  { %170 = vmatmul.mubr.f32.gmra.mrb[2].mxu0 %v66_v40  ;;  %597 = vmatprep.subr.bf16.mxu1 %v565_v26 }
  0x5f   :  { %572 = vmatpush3.bf16.msra.mxu0 %v571_v47 }
  0x60   :  { %273 = vmatmul.mubr.f32.vlgmr.msra.gmra.mrb[0].mxu1 %v65_v34  ;;  %574 = vmatprep.subr.bf16.mxu0 %v573_v50 }
  0x61   :  { %278 = vmatprep.mubr.f32.mxu1 %v731_v0  ;;  %605 = vmatpush3.bf16.msra.mxu1 %v567_v35  ;;  %v349_v0 = vld [vmem:[#allocation8 + $0xb0] sm:$0xff] }
  0x62   :  { %598 = vmatprep.subr.bf16.mxu1 %v569_v44  ;;  %v577_v55 = vpack.c.bf16 %v350_v54, %v349_v0 }
  0x63   :  { %576 = vmatpush3.bf16.msra.mxu0 %v575_v53 }
  0x64   :  { %279 = vmatmul.mubr.f32.gmra.mrb[2].mxu1 %v66_v40  ;;  %578 = vmatprep.subr.bf16.mxu0 %v577_v55 }
  0x65   :  { %606 = vmatpush3.bf16.msra.mxu1 %v571_v47 }
  0x66   :  { %599 = vmatprep.subr.bf16.mxu1 %v573_v50 }
  0x67   :  { %580 = vmatpush3.bf16.msra.mxu0 %v579_v58 }
  0x68   :  { %582 = vmatprep.subr.bf16.mxu0 %v581_v62 }
  0x69   :  { %607 = vmatpush3.bf16.msra.mxu1 %v575_v53 }
  0x6a   :  { %600 = vmatprep.subr.bf16.mxu1 %v577_v55 }
  0x6b   :  { %584 = vmatpush3.bf16.msra.mxu0 %v583_v3 }
  0x6c   :  { %586 = vmatprep.subr.bf16.mxu0 %v585_v4 }
  0x6d   :  { %608 = vmatpush3.bf16.msra.mxu1 %v579_v58 }
  0x6e   :  { %601 = vmatprep.subr.bf16.mxu1 %v581_v62 }
  0x6f   :  { %588 = vmatpush3.bf16.msra.mxu0 %v587_v9 }
  0x70   :  { %590 = vmatprep.subr.bf16.mxu0 %v589_v10 }
  0x71   :  { %609 = vmatpush3.bf16.msra.mxu1 %v583_v3 }
  0x72   :  { %602 = vmatprep.subr.bf16.mxu1 %v585_v4 }
  0x73   :  { %592 = vmatpush3.bf16.msra.mxu0 %v591_v13 }
  0x74   :  { %594 = vmatprep.subr.bf16.mxu0 %v593_v16 }
  0x75   :  { %610 = vmatpush3.bf16.msra.mxu1 %v587_v9 }
  0x76   :  { %603 = vmatprep.subr.bf16.mxu1 %v589_v10 }
  0x77   :  { %596 = vmatpush3.bf16.msra.mxu0 %v595_v19 }
  0x79   :  { %611 = vmatpush3.bf16.msra.mxu1 %v591_v13 }
  0x7a   :  { %604 = vmatprep.subr.bf16.mxu1 %v593_v16 }
  0x7d   :  { %612 = vmatpush3.bf16.msra.mxu1 %v595_v19 }
 0x12d   :  { %v165_v20 = vpop.f32.mrb[0].mxu0 }
 0x12e   :  { %v289_v21 = vmul.f32 0.044715, %v165_v20  ;;  %v167_v22 = vpop.f32.mrb[1].mxu0  ;;  %v285_v50 = vmul.f32 0.5, %v165_v20 }
 0x12f   :  { %v290_v23 = vmul.f32 0.044715, %v167_v22  ;;  %v286_v52 = vmul.f32 0.5, %v167_v22 }
 0x130   :  { %v293_v24 = vmul.f32 %v289_v21, %v165_v20 }
 0x131   :  { %v294_v25 = vmul.f32 %v290_v23, %v167_v22  ;;  %v171_v26 = vpop.f32.mrb[2].mxu0 }
 0x132   :  { %v297_v27 = vmul.f32 %v293_v24, %v165_v20  ;;  %v291_v28 = vmul.f32 0.044715, %v171_v26  ;;  %v173_v29 = vpop.f32.mrb[3].mxu0  ;;  %v287_v58 = vmul.f32 0.5, %v171_v26 }
 0x133   :  { %v298_v30 = vmul.f32 %v294_v25, %v167_v22  ;;  %v292_v31 = vmul.f32 0.044715, %v173_v29  ;;  %v274_v37 = vpop.f32.mrb[0].mxu1  ;;  %v288_v61 = vmul.f32 0.5, %v173_v29 }
 0x134   :  { %v295_v32 = vmul.f32 %v291_v28, %v171_v26  ;;  %v301_v33 = vadd.f32 %v297_v27, %v165_v20  ;;  %v276_v40 = vpop.f32.mrb[1].mxu1 }
 0x135   :  { %v296_v34 = vmul.f32 %v292_v31, %v173_v29  ;;  %v302_v35 = vadd.f32 %v298_v30, %v167_v22 }
 0x136   :  { %v299_v36 = vmul.f32 %v295_v32, %v171_v26  ;;  %v305_v38 = vmul.f32 0.7978846, %v301_v33 }
 0x137   :  { %v300_v39 = vmul.f32 %v296_v34, %v173_v29  ;;  %v306_v41 = vmul.f32 0.7978846, %v302_v35  ;;  %v280_v44 = vpop.f32.mrb[2].mxu1 }
 0x138   :  { %622 = vtanh.f32 %v305_v38  ;;  %v303_v42 = vadd.f32 %v299_v36, %v171_v26  ;;  %v282_v46 = vpop.f32.mrb[3].mxu1 }
 0x139   :  { %624 = vtanh.f32 %v306_v41  ;;  %v304_v43 = vadd.f32 %v300_v39, %v173_v29 }
 0x13a   :  { %v307_v45 = vmul.f32 0.7978846, %v303_v42 }
 0x13b   :  { %v308_v47 = vmul.f32 0.7978846, %v304_v43 }
 0x13c   :  { %626 = vtanh.f32 %v307_v45 }
 0x13d   :  { %628 = vtanh.f32 %v308_v47 }
 0x142   :  { %v623_v48 = vpop.eup %622 }
 0x143   :  { %v625_v49 = vpop.eup %624  ;;  %v313_v51 = vadd.f32 1.0, %v623_v48 }
 0x144   :  { %v314_v53 = vadd.f32 1.0, %v625_v49 }
 0x145   :  { %v317_v0 = vmul.f32 %v313_v51, %v285_v50 }
 0x146   :  { %v627_v54 = vpop.eup %626  ;;  %v318_v55 = vmul.f32 %v314_v53, %v286_v52 }
 0x147   :  { %v629_v56 = vpop.eup %628  ;;  %v321_v57 = vmul.f32 %v317_v0, %v274_v37  ;;  %v315_v59 = vadd.f32 1.0, %v627_v54 }
 0x148   :  { %v322_v60 = vmul.f32 %v318_v55, %v276_v40  ;;  %v316_v62 = vadd.f32 1.0, %v629_v56 }
 0x149   :  { %v319_v63 = vmul.f32 %v315_v59, %v287_v58 }
 0x14a   :  { %v320_v1 = vmul.f32 %v316_v62, %v288_v61  ;;  %423 = vmatprep.mubr.f32.mxu0 %v322_v60 }
 0x14b   :  { %v323_v2 = vmul.f32 %v319_v63, %v280_v44  ;;  %424 = vmatmul.mubr.f32.vlgmr.msra.gmra.mrb[4].mxu0 %v321_v57 }
 0x14c   :  { %v324_v3 = vmul.f32 %v320_v1, %v282_v46 }
 0x14e   :  { %428 = vmatprep.mubr.f32.mxu1 %v324_v3 }
 0x14f   :  { %429 = vmatmul.mubr.f32.vlgmr.msra.gmra.mrb[4].mxu1 %v323_v2 }
 0x21e   :  { %v495_v4 = vpop.f32.mrb[4].mxu0 }
 0x21f   :  { %v496_v5 = vpop.f32.mrb[5].mxu0 }
 0x220   :  { %v497_v6 = vadd.f32 %v496_v5, %v495_v4 }
 0x222   :  { %443 = vst [vmem:[#allocation9] sm:$0xff] %v497_v6  ;;  %v498_v7 = vpop.f32.mrb[4].mxu1 }
 0x223   :  { %v499_v8 = vpop.f32.mrb[5].mxu1 }
 0x224   :  { %v500_v9 = vadd.f32 %v499_v8, %v498_v7 }
 0x226   :  { %444 = vst [vmem:[#allocation9 + $0x8] sm:$0xff] %v500_v9 }
 0x227   :  { %707 = shalt.err (!%p704_p0)
}
 0x228   :  { %s708_s8 = scalar_lea.hbm %s833_s4, 256 }
 0x229   :  { %p709_p1 = scmp.ne.s32.totalorder %s833_s4, %s708_s8  ;;  %p712_p2 = scmp.lt.u32.totalorder %s708_s8, %s833_s4 }
 0x22b   :  { %p714_p3 = pnand %p712_p2, %p709_p1 }
 0x22d   :  { %717 = shalt.err (!%p714_p3)
}
 0x22e   :  { %456 = dma.vmem_to_hbm [thread:$0]  %s451_s30, 256, %s833_s4, [#allocation5], %s729_s1, %s729_s1, %s730_s18  }
 0x22f   :  { %722 = dma.done.wait [#allocation5], 256  }
 0x230   :  { %723 = vsyncadd [#allocation5], 4294967040 }
 0x231   :  { %460 = vsyncpa [#allocation4], 1 }
 0x232   :  { %461 = vsyncpa [#allocation7], 1 }
 0x233   :  { %462 = vsyncpa [#allocation5], 1 }

</bundles_post_ra>
